<compile_context>
chip_gen: v5e
topology: v5e:2x2
jax: 0.10.0
libtpu: 0.0.40
codegen_flags: <defaults>
</compile_context>

<pallas_src>
import math

import jax
import jax.numpy as jnp
from jax.experimental import pallas as pl
from jax.experimental.pallas import tpu as pltpu


# -----------------------------------------------------------------------------
# Kernels
# -----------------------------------------------------------------------------
def _decay_dense_kernel(d_ref, wt_ref, b_ref, o_ref):
    """o = exp(-relu(d @ W^T + b)); d:(bm,K'), wt:(K',N'), b:(1,N') f32."""
    gamma = jnp.maximum(
        jnp.dot(d_ref[...], wt_ref[...], preferred_element_type=jnp.float32)
        + b_ref[...], 0.0)
    o_ref[...] = jnp.exp(-gamma).astype(o_ref.dtype)


def _decay_diag_kernel(d_ref, wdiag_ref, b_ref, o_ref):
    """diag path: W*eye collapses the matmul to an elementwise scale (VPU only)."""
    d = d_ref[...].astype(jnp.float32)
    gamma = jnp.maximum(d * wdiag_ref[...] + b_ref[...], 0.0)
    o_ref[...] = jnp.exp(-gamma).astype(o_ref.dtype)


# -----------------------------------------------------------------------------
# Helpers
# -----------------------------------------------------------------------------
def _cdiv(a, b):
    return -(-a // b)


def _round_up(a, b):
    return _cdiv(a, b) * b


def _num_tensorcores():
    """Heuristic: v7x has 2 TensorCores per chip; v5e/v6e have 1."""
    try:
        kind = jax.devices()[0].device_kind.lower()
        if "v7" in kind:
            return 2
    except Exception:
        pass
    return 1


# -----------------------------------------------------------------------------
# Wrapper
# -----------------------------------------------------------------------------
def decay_forward(params, d, *, diag=False, out_dtype=None,
                  single_block_max_bytes=None, max_block_m=None):
    """Pallas equivalent of Decay.forward.

    params: {'W': (out, in), 'b': (out,)}   (torch Linear layout)
    d:      (..., in) time gaps (any float dtype; NOT cast on the host).
    Returns (..., out) decay factors exp(-relu(linear(d, W, b))), dtype
    `out_dtype` (default: d.dtype).
    """
    W = params['W']
    b = params['b']
    out_size, in_size = W.shape
    assert d.shape[-1] == in_size

    lead_shape = d.shape[:-1]
    d2 = d.reshape(-1, in_size)          # free view; no host-side dtype cast
    M = d2.shape[0]
    if out_dtype is None:
        out_dtype = d2.dtype
    out_dtype = jnp.dtype(out_dtype)

    if M == 0:
        return jnp.zeros(lead_shape + (out_size,), out_dtype)

    # --- lane-dense packing: fold g rows into lanes so the output minor dim
    #     becomes 128 (unmasked stores, dense HBM tiles).  All reshapes below
    #     are row-major-consistent views (zero HBM traffic).
    LANE = 128
    g = 1
    if out_size < LANE and LANE % out_size == 0:
        g = LANE // out_size                 # power of two
        while g > 1 and M % g != 0:
            g //= 2
        if (not diag) and g > 1 and g * in_size > 256:
            # Dense packing replicates W^T g-fold (block diagonal); cap the
            # redundant MXU work / weight footprint for large in_size.
            g = 1
    Mp = M // g
    Kp = in_size * g
    Np = out_size * g

    b_f32 = b.astype(jnp.float32).reshape(1, out_size)
    if diag:
        assert in_size == out_size, "diag decay requires input_size == output_size"
        # Re-apply the eye mask every forward (W * eye == take the diagonal).
        w_in = jnp.diagonal(W).astype(jnp.float32).reshape(1, out_size)
        if g > 1:
            w_in = jnp.tile(w_in, (1, g))
        kernel = _decay_diag_kernel
    else:
        # Weight matches d's dtype when d is bf16 (MXU-native, f32 accumulate).
        w_dtype = jnp.bfloat16 if jnp.dtype(d2.dtype) == jnp.dtype(jnp.bfloat16) \
            else jnp.float32
        wt = W.T.astype(w_dtype)                              # (K, N)
        if g > 1:
            wt = jnp.kron(jnp.eye(g, dtype=w_dtype), wt)      # (g*K, g*N) block-diag
        w_in = wt
        kernel = _decay_dense_kernel
    b_in = jnp.tile(b_f32, (1, g)) if g > 1 else b_f32

    d_in = d2.reshape(Mp, Kp) if g > 1 else d2

    in_bytes = Mp * Kp * d_in.dtype.itemsize
    out_bytes = Mp * Np * out_dtype.itemsize
    n_tc = _num_tensorcores()
    if single_block_max_bytes is None:
        # Keep moderate M on the zero-grid-overhead path on 1-TC chips; on v7x
        # prefer the gridded path earlier so both TensorCores get used.
        single_block_max_bytes = (8 << 20) if n_tc == 1 else (2 << 20)

    if in_bytes + out_bytes <= single_block_max_bytes:
        # Single fully VMEM-resident block: one launch, zero per-step overhead.
        out = pl.pallas_call(
            kernel,
            out_shape=jax.ShapeDtypeStruct((Mp, Np), out_dtype),
            in_specs=[pl.BlockSpec(memory_space=pltpu.MemorySpace.VMEM)] * 3,
            out_specs=pl.BlockSpec(memory_space=pltpu.MemorySpace.VMEM),
        )(d_in, w_in, b_in)
    else:
        # M-tiled pipeline.  block_m derived from a ~24 MiB double-buffered
        # (d + out) working set -> safe on v7x's 64 MiB VMEM and far past the
        # per-step-overhead knee on v5e/v6e.  No padding: Pallas masks the
        # final partial block's store.
        row_bytes = Kp * d_in.dtype.itemsize + Np * out_dtype.itemsize
        budget = 24 << 20
        base = 512
        block_m = max(base, (budget // (2 * row_bytes) // base) * base)
        # At least n_tc grid steps (megacore sharding) and never much larger
        # than the array itself.
        block_m = min(block_m, _round_up(_cdiv(Mp, n_tc), base))
        if max_block_m is not None:          # testing knob
            block_m = min(block_m, max_block_m)
        sub = 16 if (d_in.dtype.itemsize == 2 or out_dtype.itemsize == 2) else 8
        block_m = max(sub, (block_m // sub) * sub)

        grid = (_cdiv(Mp, block_m),)
        k_dim = d_in.shape[1]
        # NOTE: default double-buffering kept; pl.Buffered(3) on the d spec is
        # available if the (short, K-tiny) input DMA ever shows up exposed, but
        # we keep the VMEM headroom instead.
        out = pl.pallas_call(
            kernel,
            out_shape=jax.ShapeDtypeStruct((Mp, Np), out_dtype),
            grid_spec=pltpu.PrefetchScalarGridSpec(
                num_scalar_prefetch=0,
                grid=grid,
                in_specs=[
                    pl.BlockSpec((block_m, k_dim), lambda i: (i, 0)),
                    pl.BlockSpec(w_in.shape, lambda i: (0, 0)),
                    pl.BlockSpec(b_in.shape, lambda i: (0, 0)),
                ],
                out_specs=pl.BlockSpec((block_m, Np), lambda i: (i, 0)),
            ),
            compiler_params=pltpu.CompilerParams(
                dimension_semantics=("parallel",),
                vmem_limit_bytes=32 * 1024 * 1024,
            ),
        )(d_in, w_in, b_in)

    return out.reshape(lead_shape + (out_size,))


# -----------------------------------------------------------------------------
# Parameter init (mirrors BasicModules.reset_parameters)
# -----------------------------------------------------------------------------
def init_decay_params(key, input_size, output_size):
    stdv = 1.0 / math.sqrt(input_size)
    W = jax.random.uniform(key, (output_size, input_size), jnp.float32,
                           minval=-stdv, maxval=stdv)
    # TODO(synk): torch's reset_parameters skips 1-D params, leaving b as
    # uninitialized memory; we use deterministic zeros instead.
    b = jnp.zeros((output_size,), jnp.float32)
    return {'W': W, 'b': b}


def decay_reference(params, d, diag):
    """Pure-JAX reference matching the PyTorch forward."""
    W = params['W']
    if diag:
        W = W * jnp.eye(W.shape[0], dtype=W.dtype)
    gamma = jnp.maximum(
        jnp.einsum('...k,nk->...n', d.astype(jnp.float32), W) + params['b'], 0.0)
    return jnp.exp(-gamma)


# -----------------------------------------------------------------------------
if __name__ == "__main__":
    root = jax.random.PRNGKey(0)
    kd1, kp1, kd2, kp2, kd3, kp3 = jax.random.split(root, 6)

    V = 16

    # 1) dense Decay, lane-packed (g=4 -> 128-lane output), single-block path.
    B, T, H = 2, 8, 32
    d1 = jax.random.uniform(kd1, (B, T, V), jnp.float32, minval=0.0, maxval=2.0)
    p1 = init_decay_params(kp1, V, H)
    o1 = decay_forward(p1, d1, diag=False)
    r1 = decay_reference(p1, d1, diag=False)

    # 2) diag Decay, lane-packed (g=8), forced onto the tiled/pipelined path.
    Bd, Td = 4, 128
    d2_in = jax.random.uniform(kd2, (Bd, Td, V), jnp.float32, minval=0.0, maxval=2.0)
    p2 = init_decay_params(kp2, V, V)
    o2 = decay_forward(p2, d2_in, diag=True,
                       single_block_max_bytes=0, max_block_m=16)
    r2 = decay_reference(p2, d2_in, diag=True)

    # 3) dense Decay, bf16 in / bf16 out, M not divisible by the pack factor
    #    (un-packed path) and a partial final grid block (no pad / no slice).
    d3 = jax.random.uniform(kd3, (3, 7, V), jnp.float32,
                            minval=0.0, maxval=2.0).astype(jnp.bfloat16)
    p3 = init_decay_params(kp3, V, H)
    o3 = decay_forward(p3, d3, diag=False,
                       single_block_max_bytes=0, max_block_m=16)
    r3 = decay_reference(p3, d3, diag=False)

    jax.block_until_ready((o1, o2, o3))

    assert o1.shape == (B, T, H)
    assert o2.shape == (Bd, Td, V)
    assert o3.shape == (3, 7, H) and o3.dtype == jnp.bfloat16
    assert jnp.allclose(o1, r1, atol=1e-5, rtol=1e-5)
    assert jnp.allclose(o2, r2, atol=1e-5, rtol=1e-5)
    assert jnp.allclose(o3.astype(jnp.float32), r3, atol=2e-2, rtol=2e-2)
    print("KERNEL_OK")
</pallas_src>

<mosaic_0001>
module attributes {stable_mosaic.version = 11 : i64} {
  func.func @_decay_dense_kernel(%arg0: memref<4x64xf32, #tpu.memory_space<vmem>>, %arg1: memref<64x128xf32, #tpu.memory_space<vmem>>, %arg2: memref<1x128xf32, #tpu.memory_space<vmem>>, %arg3: memref<4x128xf32, #tpu.memory_space<vmem>>) attributes {dimension_semantics = [], scalar_prefetch = 0 : i64, scratch_operands = 0 : i64, tpu.core_type = #tpu.core_type<tc>} {
    %c0 = arith.constant 0 : index
    %c0_0 = arith.constant 0 : index
    %0 = vector.load %arg0[%c0, %c0_0] : memref<4x64xf32, #tpu.memory_space<vmem>>, vector<4x64xf32>
    %c0_1 = arith.constant 0 : index
    %c0_2 = arith.constant 0 : index
    %1 = vector.load %arg1[%c0_1, %c0_2] : memref<64x128xf32, #tpu.memory_space<vmem>>, vector<64x128xf32>
    %cst = arith.constant dense<0.000000e+00> : vector<4x128xf32>
    %2 = tpu.matmul %0, %1, %cst {dimension_numbers = #tpu.dot_dimension_numbers<[1], [0], [0], [1], [0, 0, 1, 1], [], []>} : vector<4x64xf32>, vector<64x128xf32>, vector<4x128xf32> -> vector<4x128xf32>
    %c0_3 = arith.constant 0 : index
    %c0_4 = arith.constant 0 : index
    %3 = vector.load %arg2[%c0_3, %c0_4] : memref<1x128xf32, #tpu.memory_space<vmem>>, vector<1x128xf32>
    %4 = vector.broadcast %3 : vector<1x128xf32> to vector<4x128xf32>
    %5 = arith.addf %2, %4 : vector<4x128xf32>
    %cst_5 = arith.constant 0.000000e+00 : f32
    %6 = vector.broadcast %cst_5 : f32 to vector<4x128xf32>
    %7 = arith.maximumf %5, %6 : vector<4x128xf32>
    %cst_6 = arith.constant 0.000000e+00 : f32
    %8 = vector.broadcast %cst_6 : f32 to vector<4x128xf32>
    %9 = arith.subf %8, %7 : vector<4x128xf32>
    %10 = math.exp %9 : vector<4x128xf32>
    %c0_7 = arith.constant 0 : index
    %c0_8 = arith.constant 0 : index
    %11 = vector.load %arg3[%c0_7, %c0_8] : memref<4x128xf32, #tpu.memory_space<vmem>>, vector<4x128xf32>
    tpu.vector_store %arg3[%c0_7, %c0_8], %10 {strides = array<i32>} : memref<4x128xf32, #tpu.memory_space<vmem>>, vector<4x128xf32>,
    return
  }
}

</mosaic_0001>

<bundles_post_ra>
// kernel: tpu_custom_call.1
= control target key start
LH: loop header
LB: loop body
LE: loop exit
PB: predicated region body
PF: predicated region fallthrough
CT: control target
= control target key end

     0   :  { %8 = vsyncpa [#allocation3], 0  ;;  %s229_s0 = inlined_call_operand.hbm [shape: f32[4,64], index: 0, kind: input, shape index: {}]   ;;  %s230_s1 = inlined_call_operand.hbm [shape: f32[64,128], index: 1, kind: input, shape index: {}]   ;;  %s231_s2 = inlined_call_operand.vmem [shape: f32[1,128], index: 2, kind: input, shape index: {}]   ;;  %s232_s3 = inlined_call_operand.hbm [shape: f32[4,128], index: 3, kind: output, shape index: {}]  }
   0x1   :  { %9 = vsyncpa [#allocation6], 0 }
   0x2   :  { %10 = vsyncpa [#allocation4], 0  ;;  %s16_s14 = sshll.u32 %s229_s0, 4  ;;  %s192_s15 = smov [#allocation2]   ;;  %s17_s14 = int_to_ptr.hbm [resolvable:$true] %s16_s14 }
   0x3   :  { %s18_s16 = sshll.u32 %s192_s15, 4  ;;  %s26_s19 = sshll.u32 %s230_s1, 4  ;;  %s19_s16 = int_to_ptr.vmem [resolvable:$true] %s18_s16  ;;  %s27_s19 = int_to_ptr.hbm [resolvable:$true] %s26_s19 }
   0x4   :  { %21 = dma.hbm_to_vmem [thread:$0]  %s17_s14, 64, %s19_s16, [#allocation3]  }
   0x5   :  { %s193_s20 = smov [#allocation5]   ;;  %s194_s22 = smov 128  }
   0x6   :  { %s28_s21 = sshll.u32 %s193_s20, 4  ;;  %s195_s23 = smov 8   ;;  %s29_s21 = int_to_ptr.vmem [resolvable:$true] %s28_s21 }
   0x7   :  { %34 = dma.hbm_to_vmem [thread:$0]  %s27_s19, 1024, %s29_s21, [#allocation6], %s194_s22, %s194_s22, %s195_s23  }
   0x8   :  { %186 = dma.done.wait [#allocation3], 64  }
   0x9   :  { %187 = vsyncadd [#allocation3], 4294967232 }
   0xa   :  { %188 = dma.done.wait [#allocation6], 1024  }
   0xb   :  { %189 = vsyncadd [#allocation6], 4294966272  ;;  %v53_v0 = vld [vmem:[#allocation5 + $0x38] sm:$0xff]  ;;  %v52_v1 = vld [vmem:[#allocation5 + $0x30] sm:$0xff]  ;;  %vm58_vm0 = vcmask 523264   ;;  %s196_s24 = smov [#allocation7]  }
   0xc   :  { %70 = vmatpush.msra.mxu0 %v53_v0  ;;  %v51_v2 = vld [vmem:[#allocation5 + $0x28] sm:$0xff]  ;;  %v50_v3 = vld [vmem:[#allocation5 + $0x20] sm:$0xff]  ;;  %v49_v4 = vld [vmem:[#allocation5 + $0x18] sm:$0xff]  ;;  %s92_s25 = sshll.u32 %s196_s24, 4  ;;  %s94_s28 = sshll.u32 %s232_s3, 4  ;;  %s93_s25 = int_to_ptr.vmem [resolvable:$true] %s92_s25  ;;  %s95_s28 = int_to_ptr.hbm [resolvable:$true] %s94_s28 }
   0xd   :  { %v48_v5 = vld [vmem:[#allocation5 + $0x10] sm:$0xff]  ;;  %v47_v6 = vld [vmem:[#allocation5 + $0x8] sm:$0xff]  ;;  %v46_v7 = vld [vmem:[#allocation5] sm:$0xff] }
   0xe   :  { %71 = vmatpush.msra.mxu0 %v52_v1  ;;  %v45_v8 = vld [vmem:[#allocation2] sm:$0xf] }
   0xf   :  { %v111_v9 = vld [vmem:[%s231_s2] ss:$0 sm:$0xff] }
  0x10   :  { %72 = vmatpush.msra.mxu0 %v51_v2 }
  0x12   :  { %73 = vmatpush.msra.mxu0 %v50_v3 }
  0x14   :  { %74 = vmatpush.msra.mxu0 %v49_v4 }
  0x16   :  { %75 = vmatpush.msra.mxu0 %v48_v5 }
  0x18   :  { %76 = vmatpush.msra.mxu0 %v47_v6 }
  0x1a   :  { %77 = vmatpush.msra.mxu0 %v46_v7 }
  0x1b   :  { %105 = vmatmul.msk.f32.vlgmr.msra.gmra.mxu0 %vm58_vm0, %v45_v8 }
  0x98   :  { %v79_v10 = vpop.f32.mrf.mxu0 }
  0x99   :  { %v80_v11 = vadd.f32 %v111_v9, %v79_v10 }
  0x9b   :  { %v82_v12 = vmax.f32 %v80_v11, 0.0 }
  0x9d   :  { %v83_v13 = vsub.f32 0.0, %v82_v12 }
  0x9f   :  { %v84_v14 = vmul.f32 1.442695, %v83_v13 }
  0xa1   :  { %112 = vpow2.f32 %v84_v14 }
  0xa7   :  { %v113_v15 = vpop.eup %112 }
  0xa8   :  { %86 = vst [vmem:[#allocation7] sm:$0xf] %v113_v15 }
  0xa9   :  { %97 = dma.vmem_to_hbm [thread:$0]  %s93_s25, 64, %s95_s28, [#allocation4]  }
  0xaa   :  { %190 = dma.done.wait [#allocation4], 64  }
  0xab   :  { %191 = vsyncadd [#allocation4], 4294967232 }
  0xac   :  { %102 = vsyncpa [#allocation3], 1 }
  0xad   :  { %103 = vsyncpa [#allocation6], 1 }
  0xae   :  { %104 = vsyncpa [#allocation4], 1 }

</bundles_post_ra>
